<compile_context>
chip_gen: v5e
topology: v5e:2x2
jax: 0.10.0
libtpu: 0.0.40
codegen_flags: <defaults>
</compile_context>

<pallas_src>
import jax
import jax.numpy as jnp
from jax import lax
from jax.experimental import pallas as pl
from jax.experimental.pallas import tpu as pltpu

LN_EPS = 1e-5                          # nn.LayerNorm default eps
VMEM_TARGET_BYTES = 48 * 1024 * 1024   # conservative: fits v7x's 64 MiB VMEM


def _custom_layer_kernel(x_ref, w_ref, b_ref, g_ref, be_ref, o_ref, acc_ref):
    """One (tile_m, tile_k) grid step: accumulate matmul; epilogue on last k."""
    k = pl.program_id(1)

    @pl.when(k == 0)
    def _():
        acc_ref[...] = jnp.zeros_like(acc_ref)

    # Linear (MXU): accumulate partial products in f32.
    acc_ref[...] += jnp.dot(x_ref[...], w_ref[...],
                            preferred_element_type=jnp.float32)

    @pl.when(k == pl.num_programs(1) - 1)
    def _():
        y = acc_ref[...] + b_ref[...]                        # bias  [tm,N]+[1,N]
        # LayerNorm over the feature (last) axis, f32 math.
        mean = jnp.mean(y, axis=-1, keepdims=True)
        centered = y - mean
        var = jnp.mean(centered * centered, axis=-1, keepdims=True)
        y = centered * lax.rsqrt(var + LN_EPS)
        y = y * g_ref[...] + be_ref[...]
        # Activation: ReLU.
        y = jnp.maximum(y, 0.0)
        # Dropout: eval mode -> identity.
        o_ref[...] = y.astype(o_ref.dtype)


def _pick_tiles(B, K, N, x_bytes, w_bytes, out_bytes, tile_m=None, tile_k=None):
    """Choose (tile_m, tile_k) honoring (8/16, 128) layout rules + VMEM budget."""
    # Sublane multiple for the M dimension of x / out blocks.
    sub_m = 8 if (x_bytes >= 4 and out_bytes >= 4) else 16

    # --- M tile: multiple of the sublane count; default 512 rows (sweep-informed).
    if tile_m is None:
        tile_m = 512
    tile_m = min(tile_m, B)
    if tile_m < B:
        tile_m = max(sub_m, (tile_m // sub_m) * sub_m)

    # --- K tile: multiple of 128 lanes that divides K exactly (ragged reduction
    #     blocks would accumulate uninitialized padding), else keep K whole.
    if tile_k is None:
        tile_k = 512
    if K <= tile_k:
        tile_k = K
    else:
        cand = (min(tile_k, K) // 128) * 128
        tile_k = K                       # fallback: no K split
        while cand >= 128:
            if K % cand == 0:
                tile_k = cand
                break
            cand -= 128

    # --- Shrink tile_m until the double-buffered working set fits the budget.
    def vmem_est(tm, tk):
        return (2 * tm * tk * x_bytes        # x tile   (double buffered)
                + 2 * tk * N * w_bytes       # w tile   (double buffered)
                + 2 * tm * N * out_bytes     # out tile (double buffered)
                + tm * N * 4                 # f32 accumulator scratch
                + 3 * 2 * N * 4)             # bias / gamma / beta

    while vmem_est(tile_m, tile_k) > VMEM_TARGET_BYTES and tile_m > sub_m:
        tile_m = max(sub_m, ((tile_m // 2) // sub_m) * sub_m)

    return tile_m, tile_k, vmem_est(tile_m, tile_k)


def custom_layer_forward(x, w, b, gamma, beta, *, tile_m=None, tile_k=None,
                         compute_dtype=None, out_dtype=None):
    """Fused ReLU(LayerNorm(x @ w + b))  (CustomLayer forward, eval mode).

    x: [B, innerSize]; w: [innerSize, outterSize] (== torch weight.T);
    b / gamma / beta: [outterSize].
    compute_dtype: cast x/w to this dtype for the MXU (jnp.bfloat16 on v6e/v7x).
    out_dtype: output dtype (jnp.bfloat16 halves writeback bytes).
    """
    B, K = x.shape
    K2, N = w.shape
    assert K == K2
    assert b.shape == (N,) and gamma.shape == (N,) and beta.shape == (N,)

    out_dtype = x.dtype if out_dtype is None else out_dtype
    if compute_dtype is not None:
        x = x.astype(compute_dtype)
        w = w.astype(compute_dtype)

    x_bytes = x.dtype.itemsize
    w_bytes = w.dtype.itemsize
    out_bytes = jnp.dtype(out_dtype).itemsize

    tile_m, tile_k, vmem_need = _pick_tiles(
        B, K, N, x_bytes, w_bytes, out_bytes, tile_m, tile_k)

    # LayerNorm / bias parameters stay in f32 for the epilogue math.
    b2 = b.reshape(1, N).astype(jnp.float32)
    g2 = gamma.reshape(1, N).astype(jnp.float32)
    be2 = beta.reshape(1, N).astype(jnp.float32)

    m_tiles = pl.cdiv(B, tile_m)
    k_tiles = pl.cdiv(K, tile_k)

    cost = pl.CostEstimate(
        flops=2 * B * K * N,
        transcendentals=0,
        bytes_accessed=(B * K * x_bytes            # x streamed once
                        + m_tiles * K * N * w_bytes  # weight re-streamed per M tile
                        + B * N * out_bytes          # output writeback
                        + 3 * N * 4),
    )

    vmem_limit = int(min(max(2 * vmem_need, 32 * 1024 * 1024),
                         64 * 1024 * 1024))

    return pl.pallas_call(
        _custom_layer_kernel,
        out_shape=jax.ShapeDtypeStruct((B, N), out_dtype),
        grid_spec=pltpu.PrefetchScalarGridSpec(
            num_scalar_prefetch=0,
            grid=(m_tiles, k_tiles),                 # reduction (K) axis last
            in_specs=[
                pl.BlockSpec((tile_m, tile_k), lambda i, k: (i, k)),   # x
                pl.BlockSpec((tile_k, N), lambda i, k: (k, 0)),        # weight
                pl.BlockSpec((1, N), lambda i, k: (0, 0)),             # bias
                pl.BlockSpec((1, N), lambda i, k: (0, 0)),             # ln gamma
                pl.BlockSpec((1, N), lambda i, k: (0, 0)),             # ln beta
            ],
            out_specs=pl.BlockSpec((tile_m, N), lambda i, k: (i, 0)),
            scratch_shapes=[pltpu.VMEM((tile_m, N), jnp.float32)],
        ),
        compiler_params=pltpu.CompilerParams(
            dimension_semantics=("parallel", "arbitrary"),
            vmem_limit_bytes=vmem_limit,
        ),
        cost_estimate=cost,
    )(x, w, b2, g2, be2)


def _reference(x, w, b, gamma, beta):
    y = x.astype(jnp.float32) @ w.astype(jnp.float32) + b
    mean = jnp.mean(y, axis=-1, keepdims=True)
    var = jnp.mean((y - mean) ** 2, axis=-1, keepdims=True)
    y = (y - mean) / jnp.sqrt(var + LN_EPS) * gamma + beta
    return jnp.maximum(y, 0.0)


if __name__ == "__main__":
    # ---- Test 1: tiny shape, f32 end-to-end, single grid step (tight check).
    batch, inner, outter = 8, 32, 128
    kx, kw, kb = jax.random.split(jax.random.PRNGKey(0), 3)
    x = jax.random.normal(kx, (batch, inner), jnp.float32)
    bound = 1.0 / (inner ** 0.5)
    w = jax.random.uniform(kw, (inner, outter), jnp.float32, -bound, bound)
    b = jax.random.uniform(kb, (outter,), jnp.float32, -bound, bound)
    gamma = jnp.ones((outter,), jnp.float32)   # nn.LayerNorm default init
    beta = jnp.zeros((outter,), jnp.float32)

    out = jax.block_until_ready(custom_layer_forward(x, w, b, gamma, beta))
    ref = _reference(x, w, b, gamma, beta)
    assert out.shape == (batch, outter)
    assert jnp.allclose(out, ref, atol=1e-5, rtol=1e-5), "f32 mismatch vs reference"

    # ---- Test 2: exercise M- and K-tiling + bf16 MXU / bf16 output path
    #      (grid = (4, 2): accumulator + epilogue + masked ragged-free tiles).
    batch2, inner2, outter2 = 64, 256, 128
    k1, k2, k3 = jax.random.split(jax.random.PRNGKey(1), 3)
    x2 = jax.random.normal(k1, (batch2, inner2), jnp.float32)
    bound2 = 1.0 / (inner2 ** 0.5)
    w2 = jax.random.uniform(k2, (inner2, outter2), jnp.float32, -bound2, bound2)
    bias2 = jax.random.uniform(k3, (outter2,), jnp.float32, -bound2, bound2)
    gamma2 = jnp.ones((outter2,), jnp.float32)
    beta2 = jnp.zeros((outter2,), jnp.float32)

    out2 = jax.block_until_ready(
        custom_layer_forward(x2, w2, bias2, gamma2, beta2,
                             tile_m=16, tile_k=128,
                             compute_dtype=jnp.bfloat16,
                             out_dtype=jnp.bfloat16))
    ref2 = _reference(x2, w2, bias2, gamma2, beta2)
    assert out2.shape == (batch2, outter2)
    assert jnp.allclose(out2.astype(jnp.float32), ref2, atol=5e-2, rtol=5e-2), \
        "bf16 mismatch vs reference"

    print("KERNEL_OK")
</pallas_src>

<mosaic_0001>
module attributes {stable_mosaic.version = 11 : i64} {
  func.func @_custom_layer_kernel(%arg0: i32, %arg1: i32, %arg2: memref<8x32xf32, #tpu.memory_space<vmem>>, %arg3: memref<32x128xf32, #tpu.memory_space<vmem>>, %arg4: memref<1x128xf32, #tpu.memory_space<vmem>>, %arg5: memref<1x128xf32, #tpu.memory_space<vmem>>, %arg6: memref<1x128xf32, #tpu.memory_space<vmem>>, %arg7: memref<8x128xf32, #tpu.memory_space<vmem>>, %arg8: memref<8x128xf32, #tpu.memory_space<vmem>>) attributes {dimension_semantics = [#tpu.dimension_semantics<parallel>, #tpu.dimension_semantics<arbitrary>], iteration_bounds = array<i64: 1, 1>, scalar_prefetch = 0 : i64, scratch_operands = 1 : i64, tpu.core_type = #tpu.core_type<tc>, window_params = [{transform_indices = @transform_0, window_bounds = array<i64: 8, 32>}, {transform_indices = @transform_1, window_bounds = array<i64: 32, 128>}, {pipeline_mode = #tpu.pipeline_mode<synchronous>, transform_indices = @transform_2, window_bounds = array<i64: 1, 128>}, {pipeline_mode = #tpu.pipeline_mode<synchronous>, transform_indices = @transform_3, window_bounds = array<i64: 1, 128>}, {pipeline_mode = #tpu.pipeline_mode<synchronous>, transform_indices = @transform_4, window_bounds = array<i64: 1, 128>}, {transform_indices = @transform_5, window_bounds = array<i64: 8, 128>}]} {
    %c0_i32 = arith.constant 0 : i32
    %0 = arith.cmpi eq, %arg1, %c0_i32 : i32
    %1 = arith.extui %0 : i1 to i32
    %c0_i32_0 = arith.constant 0 : i32
    %2 = arith.cmpi ne, %1, %c0_i32_0 : i32
    scf.if %2 {
      %cst_10 = arith.constant 0.000000e+00 : f32
      %12 = vector.broadcast %cst_10 : f32 to vector<8x128xf32>
      %c0_11 = arith.constant 0 : index
      %c0_12 = arith.constant 0 : index
      %13 = vector.load %arg8[%c0_11, %c0_12] : memref<8x128xf32, #tpu.memory_space<vmem>>, vector<8x128xf32>
      tpu.vector_store %arg8[%c0_11, %c0_12], %12 {strides = array<i32>} : memref<8x128xf32, #tpu.memory_space<vmem>>, vector<8x128xf32>,
    } else {
    }
    %c0 = arith.constant 0 : index
    %c0_1 = arith.constant 0 : index
    %3 = vector.load %arg8[%c0, %c0_1] : memref<8x128xf32, #tpu.memory_space<vmem>>, vector<8x128xf32>
    %c0_2 = arith.constant 0 : index
    %c0_3 = arith.constant 0 : index
    %4 = vector.load %arg2[%c0_2, %c0_3] : memref<8x32xf32, #tpu.memory_space<vmem>>, vector<8x32xf32>
    %c0_4 = arith.constant 0 : index
    %c0_5 = arith.constant 0 : index
    %5 = vector.load %arg3[%c0_4, %c0_5] : memref<32x128xf32, #tpu.memory_space<vmem>>, vector<32x128xf32>
    %cst = arith.constant dense<0.000000e+00> : vector<8x128xf32>
    %6 = tpu.matmul %4, %5, %cst {dimension_numbers = #tpu.dot_dimension_numbers<[1], [0], [0], [1], [0, 0, 1, 1], [], []>} : vector<8x32xf32>, vector<32x128xf32>, vector<8x128xf32> -> vector<8x128xf32>
    %7 = arith.addf %3, %6 : vector<8x128xf32>
    %c0_6 = arith.constant 0 : index
    %c0_7 = arith.constant 0 : index
    %8 = vector.load %arg8[%c0_6, %c0_7] : memref<8x128xf32, #tpu.memory_space<vmem>>, vector<8x128xf32>
    tpu.vector_store %arg8[%c0_6, %c0_7], %7 {strides = array<i32>} : memref<8x128xf32, #tpu.memory_space<vmem>>, vector<8x128xf32>,
    %c0_i32_8 = arith.constant 0 : i32
    %9 = arith.cmpi eq, %arg1, %c0_i32_8 : i32
    %10 = arith.extui %9 : i1 to i32
    %c0_i32_9 = arith.constant 0 : i32
    %11 = arith.cmpi ne, %10, %c0_i32_9 : i32
    scf.if %11 {
      %c0_10 = arith.constant 0 : index
      %c0_11 = arith.constant 0 : index
      %12 = vector.load %arg8[%c0_10, %c0_11] : memref<8x128xf32, #tpu.memory_space<vmem>>, vector<8x128xf32>
      %c0_12 = arith.constant 0 : index
      %c0_13 = arith.constant 0 : index
      %13 = vector.load %arg4[%c0_12, %c0_13] : memref<1x128xf32, #tpu.memory_space<vmem>>, vector<1x128xf32>
      %14 = vector.broadcast %13 : vector<1x128xf32> to vector<8x128xf32>
      %15 = arith.addf %12, %14 : vector<8x128xf32>
      %cst_14 = arith.constant dense<0.000000e+00> : vector<8xf32>
      %16 = vector.multi_reduction <add>, %15, %cst_14 [1] : vector<8x128xf32> to vector<8xf32>
      %17 = vector.shape_cast %16 : vector<8xf32> to vector<8x1xf32>
      %cst_15 = arith.constant 1.280000e+02 : f32
      %18 = vector.broadcast %cst_15 : f32 to vector<8x1xf32>
      %19 = arith.divf %17, %18 : vector<8x1xf32>
      %20 = vector.broadcast %19 : vector<8x1xf32> to vector<8x128xf32>
      %21 = arith.subf %15, %20 : vector<8x128xf32>
      %22 = arith.mulf %21, %21 : vector<8x128xf32>
      %cst_16 = arith.constant dense<0.000000e+00> : vector<8xf32>
      %23 = vector.multi_reduction <add>, %22, %cst_16 [1] : vector<8x128xf32> to vector<8xf32>
      %24 = vector.shape_cast %23 : vector<8xf32> to vector<8x1xf32>
      %cst_17 = arith.constant 1.280000e+02 : f32
      %25 = vector.broadcast %cst_17 : f32 to vector<8x1xf32>
      %26 = arith.divf %24, %25 : vector<8x1xf32>
      %cst_18 = arith.constant 9.99999974E-6 : f32
      %27 = vector.broadcast %cst_18 : f32 to vector<8x1xf32>
      %28 = arith.addf %26, %27 : vector<8x1xf32>
      %29 = math.rsqrt %28 : vector<8x1xf32>
      %30 = vector.broadcast %29 : vector<8x1xf32> to vector<8x128xf32>
      %31 = arith.mulf %21, %30 : vector<8x128xf32>
      %c0_19 = arith.constant 0 : index
      %c0_20 = arith.constant 0 : index
      %32 = vector.load %arg5[%c0_19, %c0_20] : memref<1x128xf32, #tpu.memory_space<vmem>>, vector<1x128xf32>
      %33 = vector.broadcast %32 : vector<1x128xf32> to vector<8x128xf32>
      %34 = arith.mulf %31, %33 : vector<8x128xf32>
      %c0_21 = arith.constant 0 : index
      %c0_22 = arith.constant 0 : index
      %35 = vector.load %arg6[%c0_21, %c0_22] : memref<1x128xf32, #tpu.memory_space<vmem>>, vector<1x128xf32>
      %36 = vector.broadcast %35 : vector<1x128xf32> to vector<8x128xf32>
      %37 = arith.addf %34, %36 : vector<8x128xf32>
      %cst_23 = arith.constant 0.000000e+00 : f32
      %38 = vector.broadcast %cst_23 : f32 to vector<8x128xf32>
      %39 = arith.maximumf %37, %38 : vector<8x128xf32>
      %c0_24 = arith.constant 0 : index
      %c0_25 = arith.constant 0 : index
      %40 = vector.load %arg7[%c0_24, %c0_25] : memref<8x128xf32, #tpu.memory_space<vmem>>, vector<8x128xf32>
      tpu.vector_store %arg7[%c0_24, %c0_25], %39 {strides = array<i32>} : memref<8x128xf32, #tpu.memory_space<vmem>>, vector<8x128xf32>,
    } else {
    }
    return
  }
  func.func @transform_0(%arg0: i32, %arg1: i32) -> (i32, i32) {
    %c0_i32 = arith.constant 0 : i32
    return %arg0, %arg1 : i32, i32
  }
  func.func @transform_1(%arg0: i32, %arg1: i32) -> (i32, i32) {
    %c0_i32 = arith.constant 0 : i32
    %c0_i32_0 = arith.constant 0 : i32
    return %arg1, %c0_i32 : i32, i32
  }
  func.func @transform_2(%arg0: i32, %arg1: i32) -> (i32, i32) {
    %c0_i32 = arith.constant 0 : i32
    %c0_i32_0 = arith.constant 0 : i32
    %c0_i32_1 = arith.constant 0 : i32
    return %c0_i32, %c0_i32_0 : i32, i32
  }
  func.func @transform_3(%arg0: i32, %arg1: i32) -> (i32, i32) {
    %c0_i32 = arith.constant 0 : i32
    %c0_i32_0 = arith.constant 0 : i32
    %c0_i32_1 = arith.constant 0 : i32
    return %c0_i32, %c0_i32_0 : i32, i32
  }
  func.func @transform_4(%arg0: i32, %arg1: i32) -> (i32, i32) {
    %c0_i32 = arith.constant 0 : i32
    %c0_i32_0 = arith.constant 0 : i32
    %c0_i32_1 = arith.constant 0 : i32
    return %c0_i32, %c0_i32_0 : i32, i32
  }
  func.func @transform_5(%arg0: i32, %arg1: i32) -> (i32, i32) {
    %c0_i32 = arith.constant 0 : i32
    %c0_i32_0 = arith.constant 0 : i32
    return %arg0, %c0_i32 : i32, i32
  }
}

</mosaic_0001>

<bundles_post_ra>
// kernel: tpu_custom_call.1
= control target key start
LH: loop header
LB: loop body
LE: loop exit
PB: predicated region body
PF: predicated region fallthrough
CT: control target
= control target key end

     0   :  { %10 = vsyncpa [#allocation4], 0  ;;  %s300_s0 = inlined_call_operand.hbm [shape: f32[8,32], index: 0, kind: input, shape index: {}]   ;;  %s301_s1 = inlined_call_operand.hbm [shape: f32[32,128], index: 1, kind: input, shape index: {}]   ;;  %s302_s2 = inlined_call_operand.vmem [shape: f32[1,128], index: 2, kind: input, shape index: {}]   ;;  %s303_s3 = inlined_call_operand.vmem [shape: f32[1,128], index: 3, kind: input, shape index: {}]   ;;  %s304_s4 = inlined_call_operand.vmem [shape: f32[1,128], index: 4, kind: input, shape index: {}]   ;;  %s305_s5 = inlined_call_operand.hbm [shape: f32[8,128], index: 5, kind: output, shape index: {}]  }
   0x1   :  { %11 = vsyncpa [#allocation7], 0 }
   0x2   :  { %12 = vsyncpa [#allocation5], 0  ;;  %s18_s20 = sshll.u32 %s300_s0, 4  ;;  %s246_s21 = smov [#allocation3]   ;;  %s19_s20 = int_to_ptr.hbm [resolvable:$true] %s18_s20 }
   0x3   :  { %s20_s22 = sshll.u32 %s246_s21, 4  ;;  %s28_s25 = sshll.u32 %s301_s1, 4  ;;  %s21_s22 = int_to_ptr.vmem [resolvable:$true] %s20_s22  ;;  %s29_s25 = int_to_ptr.hbm [resolvable:$true] %s28_s25 }
   0x4   :  { %23 = dma.hbm_to_vmem [thread:$0]  %s19_s20, 128, %s21_s22, [#allocation4]  }
   0x5   :  { %s247_s26 = smov [#allocation6]   ;;  %s248_s28 = smov 128  }
   0x6   :  { %s30_s27 = sshll.u32 %s247_s26, 4  ;;  %s249_s29 = smov 8   ;;  %s31_s27 = int_to_ptr.vmem [resolvable:$true] %s30_s27 }
   0x7   :  { %36 = dma.hbm_to_vmem [thread:$0]  %s29_s25, 512, %s31_s27, [#allocation7], %s248_s28, %s248_s28, %s249_s29  }
   0x8   :  { %240 = dma.done.wait [#allocation4], 128  }
   0x9   :  { %241 = vsyncadd [#allocation4], 4294967168 }
   0xa   :  { %242 = dma.done.wait [#allocation7], 512  }
   0xb   :  { %243 = vsyncadd [#allocation7], 4294966784  ;;  %v61_v0 = vld [vmem:[#allocation6 + $0x18] sm:$0xff]  ;;  %v60_v1 = vld [vmem:[#allocation6 + $0x10] sm:$0xff]  ;;  %vm62_vm0 = vcmask 261120   ;;  %v250_v8 = vmov 128.0  }
   0xc   :  { %78 = vmatpush.msra.mxu0 %v61_v0  ;;  %v59_v2 = vld [vmem:[#allocation6 + $0x8] sm:$0xff]  ;;  %v58_v3 = vld [vmem:[#allocation6] sm:$0xff]  ;;  %v57_v4 = vld [vmem:[#allocation3] sm:$0xff]  ;;  %164 = vrcp.f32 %v250_v8  ;;  %s251_s8 = smov [#allocation8]   ;;  %s143_s12 = sshll.u32 %s305_s5, 4  ;;  %s144_s12 = int_to_ptr.hbm [resolvable:$true] %s143_s12 }
   0xd   :  { %v161_v5 = vld [vmem:[%s302_s2] ss:$0 sm:$0xff]  ;;  %s141_s9 = sshll.u32 %s251_s8, 4  ;;  %s142_s9 = int_to_ptr.vmem [resolvable:$true] %s141_s9 }
   0xe   :  { %79 = vmatpush.msra.mxu0 %v60_v1  ;;  %v162_v28 = vld [vmem:[%s303_s3] ss:$0 sm:$0xff] }
   0xf   :  { %v163_v31 = vld [vmem:[%s304_s4] ss:$0 sm:$0xff] }
  0x10   :  { %80 = vmatpush.msra.mxu0 %v59_v2 }
  0x12   :  { %81 = vmatpush.msra.mxu0 %v58_v3  ;;  %v165_v9 = vpop.eup %164 }
  0x13   :  { %154 = vmatmul.msk.f32.vlgmr.msra.gmra.mxu0 %vm62_vm0, %v57_v4  ;;  %v100_v10 = vmul.f32 128.0, %v165_v9  ;;  %vm104_vm1 = vweird.f32 %v165_v9 }
  0x15   :  { %v101_v11 = vsub.f32 1.0, %v100_v10 }
  0x17   :  { %v102_v12 = vmul.f32 %v165_v9, %v101_v11 }
  0x19   :  { %v103_v13 = vadd.f32 %v165_v9, %v102_v12 }
  0x1b   :  { %v105_v14 = vsel %vm104_vm1, %v165_v9, %v103_v13 }
  0x90   :  { %v83_v6 = vpop.f32.mrf.mxu0 }
  0x91   :  { %v96_v7 = vadd.f32 %v161_v5, %v83_v6 }
  0x93   :  { %97 = vadd.xlane.f32.xlu0 %v96_v7 }
 0x106   :  { %v98_v15 = vpop.xlane.xlu0 %97 }
 0x107   :  { %v106_v16 = vmul.f32 %v105_v14, %v98_v15 }
 0x109   :  { %v107_v17 = vsub.f32 %v96_v7, %v106_v16 }
 0x10b   :  { %v108_v18 = vmul.f32 %v107_v17, %v107_v17 }
 0x10d   :  { %109 = vadd.xlane.f32.xlu0 %v108_v18 }
 0x180   :  { %v110_v19 = vpop.xlane.xlu0 %109 }
 0x181   :  { %v111_v20 = vmul.f32 %v110_v19, %v105_v14 }
 0x183   :  { %v112_v21 = vadd.f32 1e-05, %v111_v20 }
 0x185   :  { %166 = vrsqrt.f32 %v112_v21  ;;  %vm119_vm3 = vweird.f32 %v112_v21 }
 0x18b   :  { %v167_v22 = vpop.eup %166 }
 0x18c   :  { %v114_v23 = vmul.f32 %v167_v22, %v112_v21  ;;  %vm120_vm2 = vweird.f32 %v167_v22 }
 0x18d   :  { %vm121_vm4 = vmor %vm119_vm3, %vm120_vm2 }
 0x18e   :  { %v115_v24 = vmul.f32 %v167_v22, %v114_v23 }
 0x190   :  { %v116_v25 = vmul.f32 0.5, %v115_v24 }
 0x192   :  { %v117_v26 = vsub.f32 1.5, %v116_v25 }
 0x194   :  { %v118_v27 = vmul.f32 %v167_v22, %v117_v26 }
 0x196   :  { %v122_v29 = vsel %vm121_vm4, %v167_v22, %v118_v27 }
 0x197   :  { %v123_v30 = vmul.f32 %v122_v29, %v107_v17 }
 0x199   :  { %v128_v32 = vmul.f32 %v162_v28, %v123_v30 }
 0x19b   :  { %v133_v33 = vadd.f32 %v163_v31, %v128_v32 }
 0x19d   :  { %v134_v34 = vmax.f32 %v133_v33, 0.0 }
 0x19f   :  { %135 = vst [vmem:[#allocation8] sm:$0xff] %v134_v34 }
 0x1a0   :  { %146 = dma.vmem_to_hbm [thread:$0]  %s142_s9, 128, %s144_s12, [#allocation5]  }
 0x1a1   :  { %244 = dma.done.wait [#allocation5], 128  }
 0x1a2   :  { %245 = vsyncadd [#allocation5], 4294967168 }
 0x1a3   :  { %151 = vsyncpa [#allocation4], 1 }
 0x1a4   :  { %152 = vsyncpa [#allocation7], 1 }
 0x1a5   :  { %153 = vsyncpa [#allocation5], 1 }

</bundles_post_ra>
